<compile_context>
chip_gen: v7x
topology: tpu7x:2x2x1
jax: 0.10.0
libtpu: 0.0.40
codegen_flags: <defaults>
</compile_context>

<pallas_src>
from functools import partial

import numpy as np
import jax
import jax.numpy as jnp
from jax import lax
from jax.experimental import pallas as pl
from jax.experimental.pallas import tpu as pltpu


# ----------------------------------------------------------------------------
# Kernel: one group of whole batches (R = B_blk * L rows) per grid step
# ----------------------------------------------------------------------------
def _upsample_kernel(x_ref, wm_ref, wp_ref, wn_ref, b_ref, o_ref, *, L, C, split):
    x = x_ref[...]                     # (R, C), R is a multiple of L
    R = x.shape[0]

    # Row index within its batch.  Blocks contain whole batches, so the local
    # row index mod L equals the global one -- no program_id needed.
    rin = lax.broadcasted_iota(jnp.int32, (R, C), 0) % L

    # +/-1 taps via XLU sublane rotation; zero the batch-boundary rows (which
    # are also exactly the rows where the roll wraps around the block).
    x_prev = jnp.where(rin > 0, pltpu.roll(x, 1, axis=0), 0.0)          # row m -> x[m-1]
    x_next = jnp.where(rin < L - 1, pltpu.roll(x, R - 1, axis=0), 0.0)  # row m -> x[m+1]

    f32 = jnp.float32
    if split:
        # 2C % 128 == 0: un-padded matmuls, lane-aligned half stores.
        #   wm: (C, 2C) = [W1 | W2], wp: (C, C) = W3, wn: (C, C) = W0
        y = jnp.dot(x, wm_ref[...], preferred_element_type=f32)         # (R, 2C)
        ye = y[:, :C] + jnp.dot(x_prev, wp_ref[...], preferred_element_type=f32)
        yo = y[:, C:] + jnp.dot(x_next, wn_ref[...], preferred_element_type=f32)
        b = b_ref[...]                                                   # (1, 2C) f32
        o_ref[:, :C] = (ye + b[:, :C]).astype(o_ref.dtype)
        o_ref[:, C:] = (yo + b[:, C:]).astype(o_ref.dtype)
    else:
        # Small C: fused accumulation into one (R, round_up(2C, 128)) result so
        # the store is a single unmasked lane-dense vst.  Trailing zero lanes
        # are sliced off by the wrapper.
        #   wm: [W1 | W2 | 0], wp: [W3 | 0 | 0], wn: [0 | W0 | 0]
        y = (jnp.dot(x, wm_ref[...], preferred_element_type=f32)
             + jnp.dot(x_prev, wp_ref[...], preferred_element_type=f32)
             + jnp.dot(x_next, wn_ref[...], preferred_element_type=f32))
        o_ref[...] = (y + b_ref[...]).astype(o_ref.dtype)


# ----------------------------------------------------------------------------
# Wrapper
# ----------------------------------------------------------------------------
def upsample_forward(x, weight, bias, t=None, c=None, *,
                     vmem_block_budget_bytes=8 * 1024 * 1024):
    """x: (B, L, C). weight: (C, C, 4) PyTorch ConvTranspose1d layout
    (in_channels, out_channels, k). bias: (C,). t, c unused (as in the
    reference module). Returns (B, 2L, C) in x.dtype."""
    del t, c
    B, L, C = x.shape
    M = B * L
    cdt = x.dtype                       # pass caller dtype through (no forced f32 copy)
    f32 = jnp.float32

    W = weight.astype(cdt)
    W0, W1, W2, W3 = (W[:, :, k] for k in range(4))

    split = (2 * C) % 128 == 0
    if split:
        N_total = 2 * C
        w_mid = jnp.concatenate([W1, W2], axis=1)                       # (C, 2C)
        w_prev = W3                                                     # (C, C)
        w_next = W0                                                     # (C, C)
        b_packed = jnp.concatenate([bias, bias]).astype(f32)[None, :]   # (1, 2C)
    else:
        N_total = ((2 * C + 127) // 128) * 128
        pad = N_total - 2 * C
        zc = jnp.zeros((C, C), cdt)
        zp = jnp.zeros((C, pad), cdt)
        w_mid = jnp.concatenate([W1, W2, zp], axis=1)                   # (C, N_total)
        w_prev = jnp.concatenate([W3, zc, zp], axis=1)                  # (C, N_total)
        w_next = jnp.concatenate([zc, W0, zp], axis=1)                  # (C, N_total)
        b_packed = jnp.concatenate(
            [bias, bias, jnp.zeros((pad,), bias.dtype)]).astype(f32)[None, :]

    # Rows-per-block: largest number of WHOLE batches whose (double-buffered)
    # in+out blocks fit the VMEM budget, with the sublane (8) constraint.
    itemsize = jnp.dtype(cdt).itemsize

    def block_bytes(d):
        return 2 * d * L * (C + N_total) * itemsize    # x2 double buffering

    divisors = [d for d in range(1, B + 1) if B % d == 0]
    feasible = [d for d in divisors if d == B or (d * L) % 8 == 0]
    under = [d for d in feasible if block_bytes(d) <= vmem_block_budget_bytes]
    B_blk = max(under) if under else min(feasible)
    R = B_blk * L
    grid = (B // B_blk,)

    x2 = x.reshape(M, C)                # contiguous, free

    out2 = pl.pallas_call(
        partial(_upsample_kernel, L=L, C=C, split=split),
        out_shape=jax.ShapeDtypeStruct((M, N_total), cdt),
        grid=grid,
        in_specs=[
            pl.BlockSpec((R, C), lambda i: (i, 0)),
            pl.BlockSpec(w_mid.shape, lambda i: (0, 0)),
            pl.BlockSpec(w_prev.shape, lambda i: (0, 0)),
            pl.BlockSpec(w_next.shape, lambda i: (0, 0)),
            pl.BlockSpec(b_packed.shape, lambda i: (0, 0)),
        ],
        out_specs=pl.BlockSpec((R, N_total), lambda i: (i, 0)),
        compiler_params=pltpu.CompilerParams(
            dimension_semantics=("parallel",),
            vmem_limit_bytes=32 * 1024 * 1024,
        ),
    )(x2, w_mid, w_prev, w_next, b_packed)

    if N_total != 2 * C:
        out2 = out2[:, : 2 * C]
    # (B*L, 2C) -> (B, 2L, C): contiguous reshape interleaves even/odd phases.
    return out2.reshape(B, 2 * L, C)


# ----------------------------------------------------------------------------
# Pure numpy reference (direct ConvTranspose1d scatter formulation)
# ----------------------------------------------------------------------------
def ref_upsample(x, weight, bias):
    x = np.asarray(x, np.float32)
    W = np.asarray(weight, np.float32)
    b = np.asarray(bias, np.float32)
    B, L, C = x.shape
    K, stride, pad = 4, 2, 1
    xt = np.transpose(x, (0, 2, 1))                      # (B, C_in, L)
    full = np.zeros((B, C, (L - 1) * stride + K), np.float32)
    for l in range(L):
        for k in range(K):
            full[:, :, l * stride + k] += np.einsum(
                "bi,io->bo", xt[:, :, l], W[:, :, k])
    y = full[:, :, pad:pad + 2 * L] + b[None, :, None]
    return np.transpose(y, (0, 2, 1))                    # (B, 2L, C)


# ----------------------------------------------------------------------------
# Example run
# ----------------------------------------------------------------------------
if __name__ == "__main__":
    def run_case(B, L, C, budget):
        key = jax.random.PRNGKey(0)
        kx, kw, kb = jax.random.split(key, 3)
        x = jax.random.normal(kx, (B, L, C), dtype=jnp.float32)
        weight = 0.1 * jax.random.normal(kw, (C, C, 4), dtype=jnp.float32)
        bias = 0.1 * jax.random.normal(kb, (C,), dtype=jnp.float32)
        out = jax.block_until_ready(
            upsample_forward(x, weight, bias, vmem_block_budget_bytes=budget))
        assert out.shape == (B, 2 * L, C), out.shape
        np.testing.assert_allclose(np.asarray(out), ref_upsample(x, weight, bias),
                                   rtol=1e-3, atol=1e-3)

    # Upsample(n_channels=32) on a (B=2, L=16, C=32) sequence:
    # small-C fused path, single 128-lane-dense block, grid=(1,).
    run_case(2, 16, 32, budget=8 * 1024 * 1024)
    # Larger-C config exercising the un-padded split-matmul path and a
    # multi-step "parallel" grid (budget forced small so batches are tiled).
    run_case(4, 24, 128, budget=96 * 1024)

    print("KERNEL_OK")
</pallas_src>

<mosaic_0001>
module attributes {stable_mosaic.version = 11 : i64} {
  func.func @_upsample_kernel(%arg0: i32, %arg1: memref<32x32xf32, #tpu.memory_space<vmem>>, %arg2: memref<32x128xf32, #tpu.memory_space<vmem>>, %arg3: memref<32x128xf32, #tpu.memory_space<vmem>>, %arg4: memref<32x128xf32, #tpu.memory_space<vmem>>, %arg5: memref<1x128xf32, #tpu.memory_space<vmem>>, %arg6: memref<32x128xf32, #tpu.memory_space<vmem>>) attributes {dimension_semantics = [#tpu.dimension_semantics<parallel>], iteration_bounds = array<i64: 1>, scalar_prefetch = 0 : i64, scratch_operands = 0 : i64, tpu.core_type = #tpu.core_type<tc>, window_params = [{transform_indices = @transform_0, window_bounds = array<i64: 32, 32>}, {pipeline_mode = #tpu.pipeline_mode<synchronous>, transform_indices = @transform_1, window_bounds = array<i64: 32, 128>}, {pipeline_mode = #tpu.pipeline_mode<synchronous>, transform_indices = @transform_2, window_bounds = array<i64: 32, 128>}, {pipeline_mode = #tpu.pipeline_mode<synchronous>, transform_indices = @transform_3, window_bounds = array<i64: 32, 128>}, {pipeline_mode = #tpu.pipeline_mode<synchronous>, transform_indices = @transform_4, window_bounds = array<i64: 1, 128>}, {transform_indices = @transform_5, window_bounds = array<i64: 32, 128>}]} {
    %c0 = arith.constant 0 : index
    %c0_0 = arith.constant 0 : index
    %0 = vector.load %arg1[%c0, %c0_0] : memref<32x32xf32, #tpu.memory_space<vmem>>, vector<32x32xf32>
    %1 = tpu.iota {dimensions = array<i32: 0>} : vector<32x32xi32>
    %c16_i32 = arith.constant 16 : i32
    %c0_i32 = arith.constant 0 : i32
    %2 = arith.cmpi eq, %c16_i32, %c0_i32 : i32
    %c1_i32 = arith.constant 1 : i32
    %3 = arith.select %2, %c1_i32, %c16_i32 : i32
    %4 = vector.broadcast %3 : i32 to vector<32x32xi32>
    %5 = arith.remsi %1, %4 : vector<32x32xi32>
    %c0_i32_1 = arith.constant 0 : i32
    %6 = vector.broadcast %c0_i32_1 : i32 to vector<32x32xi32>
    %7 = arith.cmpi ne, %5, %6 : vector<32x32xi32>
    %c0_i32_2 = arith.constant 0 : i32
    %8 = vector.broadcast %c0_i32_2 : i32 to vector<32x32xi32>
    %9 = arith.cmpi slt, %5, %8 : vector<32x32xi32>
    %c0_i32_3 = arith.constant 0 : i32
    %10 = arith.cmpi slt, %3, %c0_i32_3 : i32
    %11 = vector.broadcast %10 : i1 to vector<32x32xi1>
    %12 = vector.broadcast %11 : vector<32x32xi1> to vector<32x32xi1>
    %13 = arith.xori %9, %12 : vector<32x32xi1>
    %14 = arith.andi %13, %7 : vector<32x32xi1>
    %15 = vector.broadcast %3 : i32 to vector<32x32xi32>
    %16 = arith.addi %5, %15 : vector<32x32xi32>
    %17 = arith.select %14, %16, %5 : vector<32x32xi1>, vector<32x32xi32>
    %c0_i32_4 = arith.constant 0 : i32
    %18 = vector.broadcast %c0_i32_4 : i32 to vector<32x32xi32>
    %19 = arith.cmpi sgt, %17, %18 : vector<32x32xi32>
    %c1_i32_5 = arith.constant 1 : i32
    %20 = tpu.dynamic_rotate %0 by %c1_i32_5 dim 0 : vector<32x32xf32>, i32 -> vector<32x32xf32>
    %cst = arith.constant 0.000000e+00 : f32
    %21 = vector.broadcast %cst : f32 to vector<32x32xf32>
    %22 = arith.select %19, %20, %21 : vector<32x32xi1>, vector<32x32xf32>
    %c15_i32 = arith.constant 15 : i32
    %23 = vector.broadcast %c15_i32 : i32 to vector<32x32xi32>
    %24 = arith.cmpi slt, %17, %23 : vector<32x32xi32>
    %c31_i32 = arith.constant 31 : i32
    %25 = tpu.dynamic_rotate %0 by %c31_i32 dim 0 : vector<32x32xf32>, i32 -> vector<32x32xf32>
    %cst_6 = arith.constant 0.000000e+00 : f32
    %26 = vector.broadcast %cst_6 : f32 to vector<32x32xf32>
    %27 = arith.select %24, %25, %26 : vector<32x32xi1>, vector<32x32xf32>
    %c0_7 = arith.constant 0 : index
    %c0_8 = arith.constant 0 : index
    %28 = vector.load %arg2[%c0_7, %c0_8] : memref<32x128xf32, #tpu.memory_space<vmem>>, vector<32x128xf32>
    %cst_9 = arith.constant dense<0.000000e+00> : vector<32x128xf32>
    %29 = tpu.matmul %0, %28, %cst_9 {dimension_numbers = #tpu.dot_dimension_numbers<[1], [0], [0], [1], [0, 0, 1, 1], [], []>} : vector<32x32xf32>, vector<32x128xf32>, vector<32x128xf32> -> vector<32x128xf32>
    %c0_10 = arith.constant 0 : index
    %c0_11 = arith.constant 0 : index
    %30 = vector.load %arg3[%c0_10, %c0_11] : memref<32x128xf32, #tpu.memory_space<vmem>>, vector<32x128xf32>
    %cst_12 = arith.constant dense<0.000000e+00> : vector<32x128xf32>
    %31 = tpu.matmul %22, %30, %cst_12 {dimension_numbers = #tpu.dot_dimension_numbers<[1], [0], [0], [1], [0, 0, 1, 1], [], []>} : vector<32x32xf32>, vector<32x128xf32>, vector<32x128xf32> -> vector<32x128xf32>
    %32 = arith.addf %29, %31 : vector<32x128xf32>
    %c0_13 = arith.constant 0 : index
    %c0_14 = arith.constant 0 : index
    %33 = vector.load %arg4[%c0_13, %c0_14] : memref<32x128xf32, #tpu.memory_space<vmem>>, vector<32x128xf32>
    %cst_15 = arith.constant dense<0.000000e+00> : vector<32x128xf32>
    %34 = tpu.matmul %27, %33, %cst_15 {dimension_numbers = #tpu.dot_dimension_numbers<[1], [0], [0], [1], [0, 0, 1, 1], [], []>} : vector<32x32xf32>, vector<32x128xf32>, vector<32x128xf32> -> vector<32x128xf32>
    %35 = arith.addf %32, %34 : vector<32x128xf32>
    %c0_16 = arith.constant 0 : index
    %c0_17 = arith.constant 0 : index
    %36 = vector.load %arg5[%c0_16, %c0_17] : memref<1x128xf32, #tpu.memory_space<vmem>>, vector<1x128xf32>
    %37 = vector.broadcast %36 : vector<1x128xf32> to vector<32x128xf32>
    %38 = arith.addf %35, %37 : vector<32x128xf32>
    %c0_18 = arith.constant 0 : index
    %c0_19 = arith.constant 0 : index
    %39 = vector.load %arg6[%c0_18, %c0_19] : memref<32x128xf32, #tpu.memory_space<vmem>>, vector<32x128xf32>
    tpu.vector_store %arg6[%c0_18, %c0_19], %38 {strides = array<i32>} : memref<32x128xf32, #tpu.memory_space<vmem>>, vector<32x128xf32>,
    return
  }
  func.func @transform_0(%arg0: i32) -> (i32, i32) {
    %c0_i32 = arith.constant 0 : i32
    %c0_i32_0 = arith.constant 0 : i32
    return %arg0, %c0_i32 : i32, i32
  }
  func.func @transform_1(%arg0: i32) -> (i32, i32) {
    %c0_i32 = arith.constant 0 : i32
    %c0_i32_0 = arith.constant 0 : i32
    %c0_i32_1 = arith.constant 0 : i32
    return %c0_i32, %c0_i32_0 : i32, i32
  }
  func.func @transform_2(%arg0: i32) -> (i32, i32) {
    %c0_i32 = arith.constant 0 : i32
    %c0_i32_0 = arith.constant 0 : i32
    %c0_i32_1 = arith.constant 0 : i32
    return %c0_i32, %c0_i32_0 : i32, i32
  }
  func.func @transform_3(%arg0: i32) -> (i32, i32) {
    %c0_i32 = arith.constant 0 : i32
    %c0_i32_0 = arith.constant 0 : i32
    %c0_i32_1 = arith.constant 0 : i32
    return %c0_i32, %c0_i32_0 : i32, i32
  }
  func.func @transform_4(%arg0: i32) -> (i32, i32) {
    %c0_i32 = arith.constant 0 : i32
    %c0_i32_0 = arith.constant 0 : i32
    %c0_i32_1 = arith.constant 0 : i32
    return %c0_i32, %c0_i32_0 : i32, i32
  }
  func.func @transform_5(%arg0: i32) -> (i32, i32) {
    %c0_i32 = arith.constant 0 : i32
    %c0_i32_0 = arith.constant 0 : i32
    return %arg0, %c0_i32 : i32, i32
  }
}

</mosaic_0001>

<bundles_post_ra>
// kernel: tpu_custom_call.1
= control target key start
LH: loop header
LB: loop body
LE: loop exit
PB: predicated region body
PF: predicated region fallthrough
CT: control target
= control target key end

     0   :  { %10 = vsyncpa [#allocation3], 0  ;;  %s932_s0 = inlined_call_operand.hbm [shape: f32[32,32], index: 0, kind: input, shape index: {}]   ;;  %s933_s1 = inlined_call_operand.hbm [shape: f32[32,128], index: 1, kind: input, shape index: {}]   ;;  %s934_s2 = inlined_call_operand.hbm [shape: f32[32,128], index: 2, kind: input, shape index: {}]   ;;  %s935_s3 = inlined_call_operand.hbm [shape: f32[32,128], index: 3, kind: input, shape index: {}]   ;;  %s936_s4 = inlined_call_operand.vmem [shape: f32[1,128], index: 4, kind: input, shape index: {}]   ;;  %s937_s5 = inlined_call_operand.hbm [shape: f32[32,128], index: 5, kind: output, shape index: {}]  }
   0x1   :  { %11 = vsyncpa [#allocation6], 0 }
   0x2   :  { %12 = vsyncpa [#allocation9], 0 }
   0x3   :  { %13 = vsyncpa [#allocation4], 0  ;;  %s749_s18 = smov [#allocation5]   ;;  %s750_s20 = smov [#allocation2]  }
   0x4   :  { %s31_s19 = sshll.u32 %s749_s18, 4  ;;  %s19_s21 = sshll.u32 %s750_s20, 4  ;;  %s32_s19 = int_to_ptr.vmem [resolvable:$true] %s31_s19  ;;  %s786_s21 = int_to_ptr.vmem [resolvable:$true] %s19_s21 }
   0x5   :  { %s631_s24 = scalar_lea.hbm %s933_s1, 512 }
   0x6   :  { %p632_p0 = scmp.ne.s32.totalorder %s933_s1, %s631_s24  ;;  %p635_p1 = scmp.lt.u32.totalorder %s631_s24, %s933_s1 }
   0x8   :  { %p637_p2 = pnand %p635_p1, %p632_p0 }
   0xa   :  { %640 = shalt.err (!%p637_p2)
}
   0xb   :  { %s641_s29 = scalar_lea.vmem %s32_s19, 512  ;;  %p646_p4 = scmp.lt.s32.totalorder %s32_s19, %s32_s19 }
   0xc   :  { %p642_p3 = scmp.ne.s32.totalorder %s32_s19, %s641_s29  ;;  %p647_p5 = scmp.lt.s32.totalorder %s641_s29, %s641_s29 }
   0xe   :  { %p648_p6 = por %p647_p5, %p646_p4 }
  0x10   :  { %p649_p7 = pnand %p648_p6, %p642_p3 }
  0x12   :  { %652 = shalt.err (!%p649_p7)
}
  0x13   :  { %s751_s30 = smov 128   ;;  %s752_s6 = smov 8  }
  0x14   :  { %37 = dma.hbm_to_vmem [thread:$0]  %s933_s1, 512, %s32_s19, [#allocation6], %s751_s30, %s751_s30, %s752_s6  }
  0x15   :  { %s653_s11 = scalar_lea.hbm %s932_s0, 512 }
  0x16   :  { %p654_p8 = scmp.ne.s32.totalorder %s932_s0, %s653_s11  ;;  %p657_p9 = scmp.lt.u32.totalorder %s653_s11, %s932_s0 }
  0x18   :  { %p659_p10 = pnand %p657_p9, %p654_p8 }
  0x1a   :  { %662 = shalt.err (!%p659_p10)
}
  0x1b   :  { %s663_s16 = scalar_lea.vmem %s786_s21, 512  ;;  %p668_p12 = scmp.lt.s32.totalorder %s786_s21, %s786_s21 }
  0x1c   :  { %p664_p11 = scmp.ne.s32.totalorder %s786_s21, %s663_s16  ;;  %p669_p13 = scmp.lt.s32.totalorder %s663_s16, %s663_s16 }
  0x1e   :  { %p670_p0 = por %p669_p13, %p668_p12 }
  0x20   :  { %p671_p1 = pnand %p670_p0, %p664_p11 }
  0x22   :  { %674 = shalt.err (!%p671_p1)
}
  0x23   :  { %25 = dma.hbm_to_vmem [thread:$0]  %s932_s0, 512, %s786_s21, [#allocation3], %s751_s30, %s751_s30, %s752_s6  }
  0x24   :  { %s753_s18 = smov [#allocation7]   ;;  %s754_s20 = smov [#allocation8]  }
  0x25   :  { %s43_s19 = sshll.u32 %s753_s18, 4  ;;  %s55_s22 = sshll.u32 %s754_s20, 4  ;;  %s44_s19 = int_to_ptr.vmem [resolvable:$true] %s43_s19  ;;  %s823_s22 = int_to_ptr.vmem [resolvable:$true] %s55_s22 }
  0x26   :  { %s675_s25 = scalar_lea.hbm %s934_s2, 512 }
  0x27   :  { %p676_p2 = scmp.ne.s32.totalorder %s934_s2, %s675_s25  ;;  %p679_p3 = scmp.lt.u32.totalorder %s675_s25, %s934_s2 }
  0x29   :  { %p681_p4 = pnand %p679_p3, %p676_p2 }
  0x2b   :  { %684 = shalt.err (!%p681_p4)
}
  0x2c   :  { %s685_s0 = scalar_lea.vmem %s44_s19, 512  ;;  %p690_p6 = scmp.lt.s32.totalorder %s44_s19, %s44_s19 }
  0x2d   :  { %p686_p5 = scmp.ne.s32.totalorder %s44_s19, %s685_s0  ;;  %p691_p7 = scmp.lt.s32.totalorder %s685_s0, %s685_s0 }
  0x2f   :  { %p692_p8 = por %p691_p7, %p690_p6 }
  0x31   :  { %p693_p9 = pnand %p692_p8, %p686_p5 }
  0x33   :  { %696 = shalt.err (!%p693_p9)
}
  0x34   :  { %49 = dma.hbm_to_vmem [thread:$0]  %s934_s2, 512, %s44_s19, [#allocation6], %s751_s30, %s751_s30, %s752_s6  }
  0x35   :  { %s697_s10 = scalar_lea.hbm %s935_s3, 512 }
  0x36   :  { %p698_p10 = scmp.ne.s32.totalorder %s935_s3, %s697_s10  ;;  %p701_p11 = scmp.lt.u32.totalorder %s697_s10, %s935_s3 }
  0x38   :  { %p703_p12 = pnand %p701_p11, %p698_p10 }
  0x3a   :  { %706 = shalt.err (!%p703_p12)
}
  0x3b   :  { %s707_s15 = scalar_lea.vmem %s823_s22, 512  ;;  %p712_p0 = scmp.lt.s32.totalorder %s823_s22, %s823_s22 }
  0x3c   :  { %p708_p13 = scmp.ne.s32.totalorder %s823_s22, %s707_s15  ;;  %p713_p1 = scmp.lt.s32.totalorder %s707_s15, %s707_s15 }
  0x3e   :  { %p714_p2 = por %p713_p1, %p712_p0 }
  0x40   :  { %p715_p3 = pnand %p714_p2, %p708_p13 }
  0x42   :  { %718 = shalt.err (!%p715_p3)
}
  0x43   :  { %61 = dma.hbm_to_vmem [thread:$0]  %s935_s3, 512, %s823_s22, [#allocation9], %s751_s30, %s751_s30, %s752_s6  }
  0x44   :  { %741 = dma.done.wait [#allocation3], 512  }
  0x45   :  { %742 = vsyncadd [#allocation3], 4294966784 }
  0x46   :  { %743 = dma.done.wait [#allocation6], 1024  }
  0x47   :  { %744 = vsyncadd [#allocation6], 4294966272 }
  0x48   :  { %745 = dma.done.wait [#allocation9], 512  }
  0x49   :  { %746 = vsyncadd [#allocation9], 4294966784  ;;  %v80_v0 = vlaneseq  ;;  %v171_v3 = vld [vmem:[#allocation7] sm:$0xff]  ;;  %v172_v4 = vld [vmem:[#allocation7 + $0x8] sm:$0xff]  ;;  %vm175_vm0 = vcmask 261120   ;;  %s755_s17 = smov [#allocation10]  }
  0x4a   :  { %v167_v5 = vld [vmem:[#allocation5] sm:$0xff]  ;;  %v588_v7 = vpack.c.bf16 %v172_v4, %v171_v3  ;;  %v168_v8 = vld [vmem:[#allocation5 + $0x8] sm:$0xff]  ;;  %v173_v9 = vld [vmem:[#allocation7 + $0x10] sm:$0xff]  ;;  %s495_s18 = sshll.u32 %s755_s17, 4  ;;  %s496_s18 = int_to_ptr.vmem [resolvable:$true] %s495_s18 }
  0x4b   :  { %v860_v1 = vshrl.u32 %v80_v0, 7  ;;  %v174_v10 = vld [vmem:[#allocation7 + $0x18] sm:$0xff]  ;;  %v596_v11 = vpack.c.bf16 %v168_v8, %v167_v5  ;;  %v169_v13 = vld [vmem:[#allocation5 + $0x10] sm:$0xff]  ;;  %v76_v15 = vld [vmem:[#allocation2] sm:$0xff]  ;;  %p724_p5 = scmp.lt.s32.totalorder %s496_s18, %s496_s18 }
  0x4c   :  { %v592_v12 = vpack.c.bf16 %v174_v10, %v173_v9  ;;  %v170_v14 = vld [vmem:[#allocation5 + $0x18] sm:$0xff]  ;;  %589 = vmatprep.subr.bf16.mxu1 %v588_v7  ;;  %v137_v18 = vrot.slane %v76_v15, 7  ;;  %568 = vmatprep.mubr.msk.f32.mxu0 %vm175_vm0, %v76_v15  ;;  %v77_v19 = vld [vmem:[#allocation2 + $0x8] sm:$0xff]  ;;  %v370_v20 = vld [vmem:[#allocation8] sm:$0xff]  ;;  %v154_v38 = vrot.slane %v76_v15, 1 }
  0x4d   :  { %v83_v2 = vadd.s32 16, %v860_v1  ;;  %v89_v6 = vand.u32 15, %v860_v1  ;;  %v600_v16 = vpack.c.bf16 %v170_v14, %v169_v13  ;;  %v79_v17 = vld [vmem:[#allocation2 + $0x18] sm:$0xff]  ;;  %vm141_vm1 = vcmp.lt.s32.totalorder %v860_v1, 1  ;;  %597 = vmatprep.subr.bf16.mxu0 %v596_v11  ;;  %591 = vmatpush3.bf16.msra.mxu1 %v588_v7  ;;  %v371_v25 = vld [vmem:[#allocation8 + $0x8] sm:$0xff]  ;;  %v78_v26 = vld [vmem:[#allocation2 + $0x10] sm:$0xff] }
  0x4e   :  { %v140_v23 = vrot.slane %v79_v17, 7  ;;  %v138_v24 = vrot.slane %v77_v19, 7  ;;  %599 = vmatpush3.bf16.msra.mxu0 %v596_v11  ;;  %593 = vmatprep.subr.bf16.mxu1 %v592_v12  ;;  %v604_v27 = vpack.c.bf16 %v371_v25, %v370_v20  ;;  %v139_v28 = vrot.slane %v78_v26, 7  ;;  %v372_v35 = vld [vmem:[#allocation8 + $0x10] sm:$0xff]  ;;  %v373_v36 = vld [vmem:[#allocation8 + $0x18] sm:$0xff] }
  0x4f   :  { %v103_v21 = vand.u32 15, %v83_v2  ;;  %vm866_vm2 = vcmp.gt.s32.totalorder %v89_v6, 0  ;;  %v82_v29 = vadd.s32 8, %v860_v1  ;;  %v84_v30 = vadd.s32 24, %v860_v1  ;;  %601 = vmatprep.subr.bf16.mxu0 %v600_v16  ;;  %v521_v62 = vld [vmem:[%s936_s4] ss:$0 sm:$0xff] }
  0x50   :  { %v145_v31 = vsel %vm141_vm1, %v140_v23, %v137_v18  ;;  %v143_v34 = vsel %vm141_vm1, %v138_v24, %v139_v28  ;;  %v144_v37 = vsel %vm141_vm1, %v137_v18, %v138_v24  ;;  %vm158_vm4 = vcmp.lt.s32.totalorder %v860_v1, 7  ;;  %s719_s4 = scalar_lea.vmem %s496_s18, 512 }
  0x51   :  { %v146_v32 = vsel %vm866_vm2, %v145_v31, 0.0  ;;  %vm876_vm3 = vcmp.gt.s32.totalorder %v103_v21, 0  ;;  %595 = vmatpush3.bf16.msra.mxu1 %v592_v12  ;;  %v157_v39 = vrot.slane %v79_v17, 1  ;;  %v96_v40 = vand.u32 15, %v82_v29  ;;  %p720_p4 = scmp.ne.s32.totalorder %s496_s18, %s719_s4  ;;  %p725_p6 = scmp.lt.s32.totalorder %s719_s4, %s719_s4 }
  0x52   :  { %554 = vmatprep.mubr.msk.f32.mxu1 %vm175_vm0, %v146_v32  ;;  %603 = vmatpush3.bf16.msra.mxu0 %v600_v16  ;;  %v110_v41 = vand.u32 15, %v84_v30  ;;  %v148_v42 = vsel %vm876_vm3, %v143_v34, 0.0  ;;  %v608_v43 = vpack.c.bf16 %v373_v36, %v372_v35  ;;  %v155_v44 = vrot.slane %v77_v19, 1 }
  0x53   :  { %612 = vmatprep.subr.bf16.mxu1 %v604_v27  ;;  %605 = vmatprep.subr.bf16.mxu0 %v604_v27  ;;  %v156_v45 = vrot.slane %v78_v26, 1  ;;  %v142_v46 = vsel %vm141_vm1, %v139_v28, %v140_v23  ;;  %v162_v48 = vsel %vm158_vm4, %v157_v39, %v154_v38  ;;  %vm151_vm6 = vcmp.lt.s32.totalorder %v96_v40, 15  ;;  %p726_p7 = por %p725_p6, %p724_p5 }
  0x54   :  { %555 = vmatmul.mubr.msk.f32.vlgmr.msra.gmra.mrb[0].mxu1 %vm175_vm0, %v144_v37  ;;  %vm893_vm5 = vcmp.lt.s32.totalorder %v110_v41, 15  ;;  %v161_v49 = vsel %vm158_vm4, %v154_v38, %v155_v44 }
  0x55   :  { %569 = vmatmul.mubr.msk.f32.vlgmr.msra.gmra.mrb[0].mxu0 %vm175_vm0, %v77_v19  ;;  %614 = vmatpush3.bf16.msra.mxu1 %v604_v27  ;;  %v160_v50 = vsel %vm158_vm4, %v155_v44, %v156_v45  ;;  %v159_v51 = vsel %vm158_vm4, %v156_v45, %v157_v39  ;;  %v166_v52 = vsel %vm893_vm5, %v162_v48, 0.0  ;;  %p727_p8 = pnand %p726_p7, %p720_p4 }
  0x56   :  { %607 = vmatpush3.bf16.msra.mxu0 %v604_v27  ;;  %557 = vmatprep.mubr.msk.f32.mxu1 %vm175_vm0, %v148_v42  ;;  %v164_v53 = vsel %vm151_vm6, %v160_v50, 0.0 }
  0x57   :  { %571 = vmatprep.mubr.msk.f32.mxu0 %vm175_vm0, %v78_v26  ;;  %609 = vmatprep.subr.bf16.mxu0 %v608_v43 }
  0x58   :  { %558 = vmatmul.mubr.msk.f32.gmra.mrb[2].mxu1 %vm175_vm0, %v142_v46  ;;  %613 = vmatprep.subr.bf16.mxu1 %v608_v43 }
  0x59   :  { %572 = vmatmul.mubr.msk.f32.gmra.mrb[2].mxu0 %vm175_vm0, %v79_v17  ;;  %615 = vmatpush3.bf16.msra.mxu1 %v608_v43 }
  0x5a   :  { %611 = vmatpush3.bf16.msra.mxu0 %v608_v43  ;;  %582 = vmatprep.mubr.msk.f32.mxu0 %vm175_vm0, %v161_v49 }
  0x5b   :  { %585 = vmatprep.mubr.msk.f32.mxu1 %vm175_vm0, %v159_v51 }
  0x5c   :  { %586 = vmatmul.mubr.msk.f32.vlgmr.msra.gmra.mrb[4].mxu1 %vm175_vm0, %v166_v52 }
  0x5d   :  { %583 = vmatmul.mubr.msk.f32.vlgmr.msra.gmra.mrb[0].mxu0 %vm175_vm0, %v164_v53 }
 0x127   :  { %v556_v54 = vpop.f32.mrb[0].mxu1 }
 0x128   :  { %v254_v55 = vpop.f32.mrb[1].mxu1 }
 0x12b   :  { %v559_v56 = vpop.f32.mrb[2].mxu1 }
 0x12c   :  { %v573_v57 = vpop.f32.mrb[2].mxu0  ;;  %v264_v58 = vpop.f32.mrb[3].mxu1 }
 0x12d   :  { %v367_v59 = vadd.f32 %v573_v57, %v559_v56  ;;  %v361_v60 = vpop.f32.mrb[3].mxu0 }
 0x12e   :  { %v362_v61 = vadd.f32 %v361_v60, %v264_v58 }
 0x12f   :  { %v587_v63 = vpop.f32.mrb[4].mxu1 }
 0x130   :  { %v584_v0 = vpop.f32.mrb[0].mxu0  ;;  %v474_v1 = vadd.f32 %v587_v63, %v367_v59  ;;  %v462_v2 = vpop.f32.mrb[5].mxu1 }
 0x131   :  { %v616_v3 = vadd.f32 %v584_v0, %v556_v54  ;;  %v452_v4 = vpop.f32.mrb[1].mxu0  ;;  %v473_v5 = vadd.f32 %v462_v2, %v362_v61 }
 0x132   :  { %v485_v6 = vadd.f32 %v521_v62, %v474_v1  ;;  %v617_v7 = vadd.f32 %v452_v4, %v254_v55 }
 0x133   :  { %v483_v8 = vadd.f32 %v616_v3, %v521_v62  ;;  %v484_v9 = vadd.f32 %v521_v62, %v473_v5 }
 0x134   :  { %489 = vst [vmem:[#allocation10 + $0x18] sm:$0xff] %v485_v6  ;;  %v482_v10 = vadd.f32 %v617_v7, %v521_v62 }
 0x135   :  { %487 = vst [vmem:[#allocation10 + $0x8] sm:$0xff] %v483_v8  ;;  %488 = vst [vmem:[#allocation10 + $0x10] sm:$0xff] %v484_v9 }
 0x136   :  { %486 = vst [vmem:[#allocation10] sm:$0xff] %v482_v10 }
 0x137   :  { %730 = shalt.err (!%p727_p8)
}
 0x138   :  { %s731_s22 = scalar_lea.hbm %s937_s5, 512 }
 0x139   :  { %p732_p9 = scmp.ne.s32.totalorder %s937_s5, %s731_s22  ;;  %p735_p10 = scmp.lt.u32.totalorder %s731_s22, %s937_s5 }
 0x13b   :  { %p737_p11 = pnand %p735_p10, %p732_p9 }
 0x13d   :  { %740 = shalt.err (!%p737_p11)
}
 0x13e   :  { %501 = dma.vmem_to_hbm [thread:$0]  %s496_s18, 512, %s937_s5, [#allocation4], %s751_s30, %s751_s30, %s752_s6  }
 0x13f   :  { %747 = dma.done.wait [#allocation4], 512  }
 0x140   :  { %748 = vsyncadd [#allocation4], 4294966784 }
 0x141   :  { %505 = vsyncpa [#allocation3], 1 }
 0x142   :  { %506 = vsyncpa [#allocation6], 1 }
 0x143   :  { %507 = vsyncpa [#allocation9], 1 }
 0x144   :  { %508 = vsyncpa [#allocation4], 1 }

</bundles_post_ra>
